<compile_context>
chip_gen: v7x
topology: tpu7x:2x2x1
jax: 0.10.0
libtpu: 0.0.40
codegen_flags: <defaults>
</compile_context>

<pallas_src>
import functools
import math

import jax
import jax.numpy as jnp
from jax import lax
from jax.experimental import pallas as pl
from jax.experimental.pallas import tpu as pltpu

_NEG_MASK = -1.0e9    # PyTorch masked_fill value for scores == 0
_NEG_PAD = -1.0e30    # padded key columns: exp underflows to exactly 0, no inf-inf


def _mhdpa_kernel(q_ref, k_ref, adj_ref, out_ref, *, n_edges, n_valid):
    # q_ref:   (E, dkp, TQ)  Q^T row-tile, pre-scaled by 1/sqrt(d_k)
    # k_ref:   (E, dkp, Np)  K^T, all keys
    # adj_ref: (TQ, Np)      int32 edge ids (0 = no edge)
    # out_ref: (TQ, Np)      softmax attention for this (head, batch, row-tile)
    tq, np_ = out_ref.shape
    adj = adj_ref[...]

    acc = jnp.zeros((tq, np_), jnp.float32)
    for e in range(n_edges):                       # static, small E
        # Q_e @ K_e^T == qT^T @ kT  -> (TQ, Np)
        s = lax.dot_general(q_ref[e], k_ref[e], (((0,), (0,)), ((), ())),
                            preferred_element_type=jnp.float32)
        acc = acc + jnp.where(adj == (e + 1), s, 0.0)   # masked_fill(adj != e+1, 0)

    # NOTE: exact-zero masking mirrors PyTorch `masked_fill(scores == 0, -1e9)`;
    # it also masks legitimate scores that are exactly 0 (kept for parity).
    acc = jnp.where(acc == 0.0, _NEG_MASK, acc)
    if np_ > n_valid:                              # static: only when N was padded
        col = lax.broadcasted_iota(jnp.int32, (tq, np_), 1)
        acc = jnp.where(col < n_valid, acc, _NEG_PAD)

    m = jnp.max(acc, axis=-1, keepdims=True)
    ex = jnp.exp(acc - m)
    out_ref[...] = ex / jnp.sum(ex, axis=-1, keepdims=True)


def _round_up(x, m):
    return (x + m - 1) // m * m


def _pick_row_tile(np_padded, cap=512):
    tq = min(np_padded, cap)
    while np_padded % tq != 0:   # Np is a multiple of 128, so this terminates at 128
        tq -= 128
    return tq


def multi_head_dot_product_attention(h, adj_mat, wq, bq, wk, bk, n_heads):
    """h: (B, N, Fin); adj_mat: (B, N, N) int.
       wq/wk: (E, out_features, in_features); bq/bk: (E, out_features).
       Returns attn: (H, B, N, N) f32 (== PyTorch forward output)."""
    B, N, Fin = h.shape
    E, O, _ = wq.shape
    H = n_heads
    dk = O // H
    scale = 1.0 / math.sqrt(dk)

    Np = _round_up(max(N, 128), 128)     # lane-dense key axis
    dkp = _round_up(dk, 8)               # sublane-aligned per-edge slabs
    TQ = _pick_row_tile(Np)

    h_pad = jnp.pad(h.astype(jnp.float32), ((0, 0), (0, Np - N), (0, 0)))
    adj_pad = jnp.pad(adj_mat.astype(jnp.int32),
                      ((0, 0), (0, Np - N), (0, Np - N)))

    def project(w, b, apply_scale):
        # One XLA matmul per projection for ALL (edge, head) pairs:
        # (B, Np, Fin) x (E, O, Fin) -> (B, E, O, Np), lane-dense in N.
        p = jnp.einsum('bnf,eof->beon', h_pad, w.astype(jnp.float32))
        p = p + b.astype(jnp.float32)[None, :, :, None]
        p = p.reshape(B, E, H, dk, Np).transpose(0, 2, 1, 3, 4)   # (B, H, E, dk, Np)
        if dkp > dk:
            p = jnp.pad(p, ((0, 0), (0, 0), (0, 0), (0, dkp - dk), (0, 0)))
        if apply_scale:
            p = p * scale
        return p

    qT = project(wq, bq, True)    # (B, H, E, dkp, Np), already scaled
    kT = project(wk, bk, False)   # (B, H, E, dkp, Np)

    kernel = functools.partial(_mhdpa_kernel, n_edges=E, n_valid=N)

    # Head axis innermost so the adj tile (index independent of head) is not
    # re-DMA'd between head steps; B and row-tile axes are fully parallel.
    grid = (B, Np // TQ, H)

    grid_spec = pltpu.PrefetchScalarGridSpec(
        num_scalar_prefetch=0,
        grid=grid,
        in_specs=[
            pl.BlockSpec((None, None, E, dkp, TQ),
                         lambda b, qi, hd: (b, hd, 0, 0, qi)),    # Q^T row tile
            pl.BlockSpec((None, None, E, dkp, Np),
                         lambda b, qi, hd: (b, hd, 0, 0, 0)),     # K^T, all keys
            pl.BlockSpec((None, TQ, Np),
                         lambda b, qi, hd: (b, qi, 0)),           # adj (const over head)
        ],
        out_specs=pl.BlockSpec((None, None, TQ, Np),
                               lambda b, qi, hd: (hd, b, qi, 0)),
    )

    # Shape-derived VMEM budget: double-buffered blocks + elementwise temporaries.
    block_bytes = 4 * (E * dkp * TQ + E * dkp * Np + TQ * Np + TQ * Np)
    vmem_needed = 2 * block_bytes + 4 * 4 * TQ * Np
    try:
        cap = getattr(pltpu.get_tpu_info(), "vmem_capacity_bytes",
                      128 * 1024 * 1024)
    except Exception:
        cap = 128 * 1024 * 1024
    vmem_limit = int(min(max(vmem_needed, 32 * 1024 * 1024), cap * 3 // 4))

    flops = 2 * B * H * E * Np * Np * dkp
    transcendentals = B * H * Np * Np
    bytes_accessed = 4 * (2 * B * H * E * dkp * Np + B * Np * Np + B * H * Np * Np)

    out = pl.pallas_call(
        kernel,
        out_shape=jax.ShapeDtypeStruct((H, B, Np, Np), jnp.float32),
        grid_spec=grid_spec,
        compiler_params=pltpu.CompilerParams(
            dimension_semantics=("parallel", "parallel", "arbitrary"),
            vmem_limit_bytes=vmem_limit,
        ),
        cost_estimate=pl.CostEstimate(
            flops=flops,
            transcendentals=transcendentals,
            bytes_accessed=bytes_accessed,
        ),
    )(qT, kT, adj_pad)

    return out[:, :, :N, :N]


def reference(h, adj_mat, wq, bq, wk, bk, n_heads):
    """Pure-JAX mirror of the PyTorch forward (for verification)."""
    E, O, Fin = wq.shape
    B, N, _ = h.shape
    dk = O // n_heads
    adj = adj_mat[:, None, :, :]
    scores = jnp.zeros((B, n_heads, N, N), jnp.float32)
    for e in range(E):
        q = (h @ wq[e].T + bq[e]).reshape(B, N, n_heads, dk).transpose(0, 2, 1, 3)
        k = (h @ wk[e].T + bk[e]).reshape(B, N, n_heads, dk).transpose(0, 2, 1, 3)
        s = jnp.einsum('bhnd,bhmd->bhnm', q, k) / math.sqrt(dk)
        scores = scores + jnp.where(adj == (e + 1), s, 0.0)
    scores = jnp.where(scores == 0.0, -1.0e9, scores)
    attn = jax.nn.softmax(scores, axis=-1)
    return jnp.transpose(attn, (1, 0, 2, 3))


if __name__ == "__main__":
    # Small shapes consistent with the module.
    N_bt, N_nodes = 2, 8
    in_features, out_features, n_heads = 32, 32, 4
    edges = [1, 2, 3]
    E = len(edges)

    key = jax.random.PRNGKey(0)
    k_h, k_adj, k_wq, k_bq, k_wk, k_bk = jax.random.split(key, 6)

    h = jax.random.normal(k_h, (N_bt, N_nodes, in_features), dtype=jnp.float32)
    adj_mat = jax.random.randint(k_adj, (N_bt, N_nodes, N_nodes), 0, E + 1,
                                 dtype=jnp.int32)

    bound = 1.0 / math.sqrt(in_features)
    wq = jax.random.uniform(k_wq, (E, out_features, in_features),
                            minval=-bound, maxval=bound, dtype=jnp.float32)
    wk = jax.random.uniform(k_wk, (E, out_features, in_features),
                            minval=-bound, maxval=bound, dtype=jnp.float32)
    bq = jax.random.uniform(k_bq, (E, out_features),
                            minval=-bound, maxval=bound, dtype=jnp.float32)
    bk = jax.random.uniform(k_bk, (E, out_features),
                            minval=-bound, maxval=bound, dtype=jnp.float32)

    out = multi_head_dot_product_attention(h, adj_mat, wq, bq, wk, bk, n_heads)
    out = jax.block_until_ready(out)

    ref = reference(h, adj_mat, wq, bq, wk, bk, n_heads)
    assert out.shape == (n_heads, N_bt, N_nodes, N_nodes)
    err = float(jnp.max(jnp.abs(out - ref)))
    assert jnp.allclose(out, ref, rtol=1e-4, atol=1e-4), err

    print("KERNEL_OK")
</pallas_src>

<mosaic_0001>
module attributes {stable_mosaic.version = 11 : i64} {
  func.func @_mhdpa_kernel(%arg0: i32, %arg1: i32, %arg2: i32, %arg3: memref<1x1x3x8x128xf32, #tpu.memory_space<vmem>>, %arg4: memref<1x1x3x8x128xf32, #tpu.memory_space<vmem>>, %arg5: memref<1x128x128xi32, #tpu.memory_space<vmem>>, %arg6: memref<1x1x128x128xf32, #tpu.memory_space<vmem>>) attributes {dimension_semantics = [#tpu.dimension_semantics<parallel>, #tpu.dimension_semantics<parallel>, #tpu.dimension_semantics<arbitrary>], iteration_bounds = array<i64: 2, 1, 4>, scalar_prefetch = 0 : i64, scratch_operands = 0 : i64, tpu.core_type = #tpu.core_type<tc>, window_params = [{transform_indices = @transform_0, window_bounds = array<i64: 1, 1, 3, 8, 128>}, {transform_indices = @transform_1, window_bounds = array<i64: 1, 1, 3, 8, 128>}, {transform_indices = @transform_2, window_bounds = array<i64: 1, 128, 128>}, {transform_indices = @transform_3, window_bounds = array<i64: 1, 1, 128, 128>}]} {
    %c0 = arith.constant 0 : index
    %c0_0 = arith.constant 0 : index
    %c0_1 = arith.constant 0 : index
    %0 = vector.load %arg5[%c0, %c0_0, %c0_1] : memref<1x128x128xi32, #tpu.memory_space<vmem>>, vector<1x128x128xi32>
    %1 = vector.shape_cast %0 : vector<1x128x128xi32> to vector<128x128xi32>
    %cst = arith.constant 0.000000e+00 : f32
    %2 = vector.broadcast %cst : f32 to vector<128x128xf32>
    %c0_2 = arith.constant 0 : index
    %c0_3 = arith.constant 0 : index
    %c0_4 = arith.constant 0 : index
    %c0_5 = arith.constant 0 : index
    %c0_6 = arith.constant 0 : index
    %3 = vector.load %arg3[%c0_2, %c0_3, %c0_4, %c0_5, %c0_6] : memref<1x1x3x8x128xf32, #tpu.memory_space<vmem>>, vector<1x1x1x8x128xf32>
    %4 = vector.shape_cast %3 : vector<1x1x1x8x128xf32> to vector<8x128xf32>
    %c0_7 = arith.constant 0 : index
    %c0_8 = arith.constant 0 : index
    %c0_9 = arith.constant 0 : index
    %c0_10 = arith.constant 0 : index
    %c0_11 = arith.constant 0 : index
    %5 = vector.load %arg4[%c0_7, %c0_8, %c0_9, %c0_10, %c0_11] : memref<1x1x3x8x128xf32, #tpu.memory_space<vmem>>, vector<1x1x1x8x128xf32>
    %6 = vector.shape_cast %5 : vector<1x1x1x8x128xf32> to vector<8x128xf32>
    %cst_12 = arith.constant dense<0.000000e+00> : vector<128x128xf32>
    %7 = tpu.matmul %4, %6, %cst_12 {dimension_numbers = #tpu.dot_dimension_numbers<[0], [0], [1], [1], [0, 1, 1, 1], [], []>} : vector<8x128xf32>, vector<8x128xf32>, vector<128x128xf32> -> vector<128x128xf32>
    %c1_i32 = arith.constant 1 : i32
    %8 = vector.broadcast %c1_i32 : i32 to vector<128x128xi32>
    %9 = arith.cmpi eq, %1, %8 : vector<128x128xi32>
    %cst_13 = arith.constant 0.000000e+00 : f32
    %10 = vector.broadcast %cst_13 : f32 to vector<128x128xf32>
    %11 = arith.select %9, %7, %10 : vector<128x128xi1>, vector<128x128xf32>
    %12 = arith.addf %2, %11 : vector<128x128xf32>
    %c0_14 = arith.constant 0 : index
    %c0_15 = arith.constant 0 : index
    %c1 = arith.constant 1 : index
    %c0_16 = arith.constant 0 : index
    %c0_17 = arith.constant 0 : index
    %13 = vector.load %arg3[%c0_14, %c0_15, %c1, %c0_16, %c0_17] : memref<1x1x3x8x128xf32, #tpu.memory_space<vmem>>, vector<1x1x1x8x128xf32>
    %14 = vector.shape_cast %13 : vector<1x1x1x8x128xf32> to vector<8x128xf32>
    %c0_18 = arith.constant 0 : index
    %c0_19 = arith.constant 0 : index
    %c1_20 = arith.constant 1 : index
    %c0_21 = arith.constant 0 : index
    %c0_22 = arith.constant 0 : index
    %15 = vector.load %arg4[%c0_18, %c0_19, %c1_20, %c0_21, %c0_22] : memref<1x1x3x8x128xf32, #tpu.memory_space<vmem>>, vector<1x1x1x8x128xf32>
    %16 = vector.shape_cast %15 : vector<1x1x1x8x128xf32> to vector<8x128xf32>
    %cst_23 = arith.constant dense<0.000000e+00> : vector<128x128xf32>
    %17 = tpu.matmul %14, %16, %cst_23 {dimension_numbers = #tpu.dot_dimension_numbers<[0], [0], [1], [1], [0, 1, 1, 1], [], []>} : vector<8x128xf32>, vector<8x128xf32>, vector<128x128xf32> -> vector<128x128xf32>
    %c2_i32 = arith.constant 2 : i32
    %18 = vector.broadcast %c2_i32 : i32 to vector<128x128xi32>
    %19 = arith.cmpi eq, %1, %18 : vector<128x128xi32>
    %cst_24 = arith.constant 0.000000e+00 : f32
    %20 = vector.broadcast %cst_24 : f32 to vector<128x128xf32>
    %21 = arith.select %19, %17, %20 : vector<128x128xi1>, vector<128x128xf32>
    %22 = arith.addf %12, %21 : vector<128x128xf32>
    %c0_25 = arith.constant 0 : index
    %c0_26 = arith.constant 0 : index
    %c2 = arith.constant 2 : index
    %c0_27 = arith.constant 0 : index
    %c0_28 = arith.constant 0 : index
    %23 = vector.load %arg3[%c0_25, %c0_26, %c2, %c0_27, %c0_28] : memref<1x1x3x8x128xf32, #tpu.memory_space<vmem>>, vector<1x1x1x8x128xf32>
    %24 = vector.shape_cast %23 : vector<1x1x1x8x128xf32> to vector<8x128xf32>
    %c0_29 = arith.constant 0 : index
    %c0_30 = arith.constant 0 : index
    %c2_31 = arith.constant 2 : index
    %c0_32 = arith.constant 0 : index
    %c0_33 = arith.constant 0 : index
    %25 = vector.load %arg4[%c0_29, %c0_30, %c2_31, %c0_32, %c0_33] : memref<1x1x3x8x128xf32, #tpu.memory_space<vmem>>, vector<1x1x1x8x128xf32>
    %26 = vector.shape_cast %25 : vector<1x1x1x8x128xf32> to vector<8x128xf32>
    %cst_34 = arith.constant dense<0.000000e+00> : vector<128x128xf32>
    %27 = tpu.matmul %24, %26, %cst_34 {dimension_numbers = #tpu.dot_dimension_numbers<[0], [0], [1], [1], [0, 1, 1, 1], [], []>} : vector<8x128xf32>, vector<8x128xf32>, vector<128x128xf32> -> vector<128x128xf32>
    %c3_i32 = arith.constant 3 : i32
    %28 = vector.broadcast %c3_i32 : i32 to vector<128x128xi32>
    %29 = arith.cmpi eq, %1, %28 : vector<128x128xi32>
    %cst_35 = arith.constant 0.000000e+00 : f32
    %30 = vector.broadcast %cst_35 : f32 to vector<128x128xf32>
    %31 = arith.select %29, %27, %30 : vector<128x128xi1>, vector<128x128xf32>
    %32 = arith.addf %22, %31 : vector<128x128xf32>
    %cst_36 = arith.constant 0.000000e+00 : f32
    %33 = vector.broadcast %cst_36 : f32 to vector<128x128xf32>
    %34 = arith.cmpf oeq, %32, %33 : vector<128x128xf32>
    %cst_37 = arith.constant -1.000000e+09 : f32
    %35 = vector.broadcast %cst_37 : f32 to vector<128x128xf32>
    %36 = arith.select %34, %35, %32 : vector<128x128xi1>, vector<128x128xf32>
    %37 = tpu.iota {dimensions = array<i32: 1>} : vector<128x128xi32>
    %c8_i32 = arith.constant 8 : i32
    %38 = vector.broadcast %c8_i32 : i32 to vector<128x128xi32>
    %39 = arith.cmpi slt, %37, %38 : vector<128x128xi32>
    %cst_38 = arith.constant -1.000000e+30 : f32
    %40 = vector.broadcast %cst_38 : f32 to vector<128x128xf32>
    %41 = arith.select %39, %36, %40 : vector<128x128xi1>, vector<128x128xf32>
    %cst_39 = arith.constant dense<0xFF800000> : vector<128xf32>
    %42 = vector.multi_reduction <maximumf>, %41, %cst_39 [1] : vector<128x128xf32> to vector<128xf32>
    %43 = vector.shape_cast %42 : vector<128xf32> to vector<128x1xf32>
    %44 = vector.broadcast %43 : vector<128x1xf32> to vector<128x128xf32>
    %45 = arith.subf %41, %44 : vector<128x128xf32>
    %46 = math.exp %45 : vector<128x128xf32>
    %cst_40 = arith.constant dense<0.000000e+00> : vector<128xf32>
    %47 = vector.multi_reduction <add>, %46, %cst_40 [1] : vector<128x128xf32> to vector<128xf32>
    %48 = vector.shape_cast %47 : vector<128xf32> to vector<128x1xf32>
    %49 = vector.broadcast %48 : vector<128x1xf32> to vector<128x128xf32>
    %50 = arith.divf %46, %49 : vector<128x128xf32>
    %c0_41 = arith.constant 0 : index
    %c0_42 = arith.constant 0 : index
    %c0_43 = arith.constant 0 : index
    %c0_44 = arith.constant 0 : index
    %51 = vector.load %arg6[%c0_41, %c0_42, %c0_43, %c0_44] : memref<1x1x128x128xf32, #tpu.memory_space<vmem>>, vector<1x1x128x128xf32>
    %52 = vector.shape_cast %51 : vector<1x1x128x128xf32> to vector<128x128xf32>
    %53 = vector.shape_cast %50 : vector<128x128xf32> to vector<1x1x128x128xf32>
    tpu.vector_store %arg6[%c0_41, %c0_42, %c0_43, %c0_44], %53 {strides = array<i32>} : memref<1x1x128x128xf32, #tpu.memory_space<vmem>>, vector<1x1x128x128xf32>,
    return
  }
  func.func @transform_0(%arg0: i32, %arg1: i32, %arg2: i32) -> (i32, i32, i32, i32, i32) {
    %c0_i32 = arith.constant 0 : i32
    %c0_i32_0 = arith.constant 0 : i32
    %c0_i32_1 = arith.constant 0 : i32
    return %arg0, %arg2, %c0_i32, %c0_i32_0, %arg1 : i32, i32, i32, i32, i32
  }
  func.func @transform_1(%arg0: i32, %arg1: i32, %arg2: i32) -> (i32, i32, i32, i32, i32) {
    %c0_i32 = arith.constant 0 : i32
    %c0_i32_0 = arith.constant 0 : i32
    %c0_i32_1 = arith.constant 0 : i32
    %c0_i32_2 = arith.constant 0 : i32
    return %arg0, %arg2, %c0_i32, %c0_i32_0, %c0_i32_1 : i32, i32, i32, i32, i32
  }
  func.func @transform_2(%arg0: i32, %arg1: i32, %arg2: i32) -> (i32, i32, i32) {
    %c0_i32 = arith.constant 0 : i32
    %c0_i32_0 = arith.constant 0 : i32
    return %arg0, %arg1, %c0_i32 : i32, i32, i32
  }
  func.func @transform_3(%arg0: i32, %arg1: i32, %arg2: i32) -> (i32, i32, i32, i32) {
    %c0_i32 = arith.constant 0 : i32
    %c0_i32_0 = arith.constant 0 : i32
    return %arg2, %arg0, %arg1, %c0_i32 : i32, i32, i32, i32
  }
}

</mosaic_0001>

<bundles_post_ra>
// kernel: tpu_custom_call.1
= control target key start
LH: loop header
LB: loop body
LE: loop exit
PB: predicated region body
PF: predicated region fallthrough
CT: control target
= control target key end

     0   :  { %s2874_s0 = inlined_call_operand.hbm [shape: f32[2,4,3,8,128], index: 0, kind: input, shape index: {}]   ;;  %s2875_s1 = inlined_call_operand.hbm [shape: f32[2,4,3,8,128], index: 1, kind: input, shape index: {}]   ;;  %s2876_s2 = inlined_call_operand.hbm [shape: s32[2,128,128], index: 2, kind: input, shape index: {}]   ;;  %s2877_s3 = inlined_call_operand.hbm [shape: f32[4,2,128,128], index: 3, kind: output, shape index: {}]  }
   0x1   :  { %2895 = sst [smem:[#allocation19_spill]] %s2875_s1 }
   0x2   :  { %8 = vsyncpa [#allocation3], 0 }
   0x3   :  { %10 = vsyncpa [#allocation3 + $0x1], 0 }
   0x4   :  { %11 = vsyncpa [#allocation6], 0 }
   0x5   :  { %13 = vsyncpa [#allocation6 + $0x1], 0 }
   0x6   :  { %14 = vsyncpa [#allocation4], 0 }
   0x7   :  { %16 = vsyncpa [#allocation4 + $0x1], 0  ;;  %s2166_s12 = smov 0   ;;  %s2168_s13 = smov 0  }
   0x8   :  { %s2170_s14 = smov 0   ;;  %s2172_s15 = smov 0  }
   0x9   :  { %s2174_s16 = smov 0   ;;  %s2176_s17 = smov 0  }
   0xa   :  { %s2178_s18 = smov 0   ;;  %s2180_s19 = smov 0  }
   0xb   :  { %s2182_s20 = smov 0   ;;  %s2184_s21 = smov 0  }
   0xc   :  { %s2186_s22 = smov 0  }
   0xd LB: > { %2896 = sst [smem:[#allocation13_spill]] %s2108_s15  ;;  %s2222_s23 = sadd.s32 4294967295, %s2136_s22   ;;  %s2136_s22 = sphi %s2186_s22, %s22_s22   ;;  %s2132_s21 = sphi %s2184_s21, %s2938_s21   ;;  %s2128_s20 = sphi %s2182_s20, %s2929_s20   ;;  %s2124_s19 = sphi %s2180_s19, %s2937_s19   ;;  %s2120_s18 = sphi %s2178_s18, %s2928_s18   ;;  %s2116_s17 = sphi %s2176_s17, %s2936_s17   ;;  %s2112_s16 = sphi %s2174_s16, %s2935_s16   ;;  %s2108_s15 = sphi %s2172_s15, %s2934_s15   ;;  %s2104_s14 = sphi %s2170_s14, %s2933_s14   ;;  %s2100_s13 = sphi %s2168_s13, %s2932_s13   ;;  %s2096_s12 = sphi %s2166_s12, %s2931_s12  }
   0xe   : > { %2897 = sst [smem:[#allocation14_spill]] %s2128_s20  ;;  %s1527_s24 = sadd.s32 4294967294, %s2136_s22  }
   0xf   : > { %s34_s25 = sadd.s32 1, %s2128_s20  ;;  %s41_s26 = sadd.s32 1, %s2132_s21 }
  0x10   : > { %p35_p0 = scmp.ge.s32.totalorder %s34_s25, 4  ;;  %s52_s27 = sadd.s32 1, %s2116_s17 }
  0x11   : > { %p59_p1 = scmp.ne.s32.totalorder %s2116_s17, %s2112_s16  ;;  %p2886_p2 = scmp.eq.s32.totalorder %s2136_s22, 0 }
  0x12   : > { %s2940_s25 = smov (%p35_p0, %s34_s25), 0  ;;  %s2942_s26 = smov (!%p35_p0, %s41_s26), %s2132_s21 }
  0x13   : > { %2898 = sst [smem:[#allocation15_spill]] %s2940_s25  ;;  %s46_s28 = ssub.s32 %s2128_s20, %s2940_s25 }
  0x14   : > { %p2238_p3 = por %p2886_p2, %p59_p1  ;;  %p43_p4 = scmp.ge.s32.totalorder %s2942_s26, 2 }
  0x15   : > { %p65_p5 = scmp.ne.s32.totalorder %s2112_s16, %s2108_s15  ;;  %p2885_p6 = scmp.eq.s32.totalorder %s2222_s23, 0 }
  0x16   : > { %p149_p7 = scmp.eq.s32.totalorder %s2222_s23, 7  ;;  %s2944_s26 = smov (%p43_p4, %s2942_s26), 0 }
  0x17   : > { %2900 = sst [smem:[#allocation16_spill]] %s2944_s26  ;;  %p2250_p8 = por %p2885_p6, %p65_p5 }
  0x18   : > { %p2254_p9 = por %p149_p7, %p59_p1  ;;  %s2260_s5 = ssub.s32 %s2132_s21, %s2944_s26 }
  0x19   : > { %s2901_s30 = scalar_select %p2250_p8, 1, 0 }
  0x1a   : > { %s2902_s4 = scalar_select %p2254_p9, 1, 0 }
  0x1b   : > { %p155_p10 = scmp.eq.s32.totalorder %s1527_s24, 7  ;;  %s47_s6 = sor.u32 %s46_s28, %s2260_s5 }
  0x1c   : > { %p50_p12 = scmp.eq.s32.totalorder %s47_s6, 0  ;;  %p2884_p0 = scmp.lt.s32.totalorder %s2136_s22, 8 }
  0x1d   : > { %p2264_p13 = por %p155_p10, %p65_p5  ;;  %s2880_s9 = sand.u32 1, %s2116_s17  }
  0x1e   : > { %s2270_s8 = scalar_select %p50_p12, %s2116_s17, %s52_s27  }
  0x1f   : > { %s2903_s7 = scalar_select %p2264_p13, 1, 0 }
  0x20   : > { %2905 = sst [smem:[#allocation18_spill]] %s2270_s8  ;;  %s1729_s10 = smul.u32 3, %s2128_s20 }
  0x21   : > { %2904 = sst [smem:[#allocation17_spill]] %s2903_s7  ;;  %s2276_s11 = smul.u32 24, %s2880_s9 }
  0x22   : > { %p2282_p1 = pnand %p2884_p0, %p2238_p3  ;;  %s1730_s28 = smul.u32 12, %s2132_s21 }
  0x23   : > { %s199_s27 = sand.u32 1, %s2136_s22   ;;  %s2907_s1 = sld [smem:[#allocation19_spill]] }
  0x24   : > { %s2287_s6 = sadd.s32 %s1730_s28, %s1729_s10  ;;  %s203_s20 = scalar_lea.vmem [#allocation5], %s2276_s11 }
  0x25   : > { %s2882_s26 = sshll.u32 %s2287_s6, 7  ;;  %s212_s8 = sshll.u32 %s203_s20, 4  ;;  %s2300_s8 = int_to_ptr.vmem [resolvable:$true] %s212_s8 }
  0x26   : > { %s2303_s10 = scalar_lea.sflag [#allocation6], %s199_s27  ;;  %p1918_p7 = pneg %p2282_p1 }
  0x29   : > { %s2296_s29 = scalar_lea.hbm %s2907_s1, %s2882_s26  ;;  %s1921_s26 = scalar_lea.hbm %s2907_s1, 3072 }
  0x2a   : > { %s1916_s28 = scalar_lea.hbm %s2296_s29, 384  ;;  %p1922_p0 = scmp.lt.u32.totalorder %s2296_s29, %s2907_s1 }
  0x2b   : > { %p1917_p5 = scmp.ne.s32.totalorder %s2296_s29, %s1916_s28  ;;  %p1923_p6 = scmp.lt.u32.totalorder %s1921_s26, %s1916_s28 }
  0x2c   : > { %p1925_p11 = scmp.lt.u32.totalorder %s1916_s28, %s2296_s29 }
  0x2d   : > { %p1919_p10 = pnand %p1918_p7, %p1917_p5  ;;  %p1924_p2 = por %p1923_p6, %p1922_p0 }
  0x2f   : > { %p1920_p12 = pneg %p1919_p10  ;;  %p1926_p3 = por %p1925_p11, %p1924_p2 }
  0x31   : > { %p1927_p4 = pnand %p1926_p3, %p1920_p12 }
  0x33   : > { %1930 = shalt.err (!%p1927_p4)
}
  0x34   : > { %s1931_s27 = scalar_lea.vmem %s2300_s8, 384  ;;  %s2138_s25 = smov [#allocation5]  }
  0x35   : > { %p1932_p5 = scmp.ne.s32.totalorder %s2300_s8, %s1931_s27  ;;  %s1936_s9 = sshll.u32 %s2138_s25, 4  ;;  %s1937_s9 = int_to_ptr.vmem [resolvable:$false] %s1936_s9 }
  0x36   : > { %s1938_s7 = scalar_lea.vmem %s1937_s9, 768  ;;  %p1939_p9 = scmp.lt.s32.totalorder %s2300_s8, %s1937_s9 }
  0x37   : > { %p1934_p10 = pnand %p1932_p5, %p1918_p7  ;;  %p1940_p6 = scmp.lt.s32.totalorder %s1938_s7, %s1931_s27 }
  0x39   : > { %p1935_p13 = pneg %p1934_p10  ;;  %p1941_p0 = por %p1940_p6, %p1939_p9 }
  0x3b   : > { %p1942_p2 = pnand %p1941_p0, %p1935_p13 }
  0x3d   : > { %1945 = shalt.err (!%p1942_p2)
}
  0x3e   : > { %s2889_s26 = smov 128   ;;  %s2891_s28 = smov 8  }
  0x3f   : > { %1749 = dma.hbm_to_vmem [thread:$0]  (!%p2282_p1), %s2296_s29, 384, %s2300_s8, %s2303_s10, %s2889_s26, %s2889_s26, %s2891_s28  }
  0x40   : > { %p2908_p9 = scmp.lt.s32.totalorder %s2136_s22, 9  ;;  %p2909_p11 = scmp.ge.s32.totalorder %s2136_s22, 1 }
  0x41   : > { %s2911_s27 = sshll.u32 %s2287_s6, 7  ;;  %s179_s1 = scalar_lea.vmem [#allocation2], %s2276_s11 }
  0x42   : > { %p2338_p13 = pnand %p2909_p11, %p2908_p9  ;;  %s2347_s7 = scalar_lea.hbm %s2874_s0, %s2911_s27 }
  0x43   : > { %s189_s15 = sshll.u32 %s179_s1, 4  ;;  %s2912_s8 = sand.u32 1, %s2116_s17   ;;  %s2350_s15 = int_to_ptr.vmem [resolvable:$true] %s189_s15 }
  0x44   : > { %s2354_s29 = scalar_lea.sflag [#allocation3], %s2912_s8  ;;  %s1946_s26 = scalar_lea.hbm %s2347_s7, 384 }
  0x45   : > { %p1947_p3 = scmp.ne.s32.totalorder %s2347_s7, %s1946_s26  ;;  %s1951_s25 = scalar_lea.hbm %s2874_s0, 3072 }
  0x46   : > { %p1952_p5 = scmp.lt.u32.totalorder %s2347_s7, %s2874_s0  ;;  %p1953_p10 = scmp.lt.u32.totalorder %s1951_s25, %s1946_s26 }
  0x47   : > { %p1949_p4 = pnand %p1947_p3, %p1918_p7  ;;  %p1955_p0 = scmp.lt.u32.totalorder %s1946_s26, %s2347_s7 }
  0x48   : > { %p1954_p6 = por %p1953_p10, %p1952_p5 }
  0x49   : > { %p1950_p12 = pneg %p1949_p4 }
  0x4a   : > { %p1956_p2 = por %p1955_p0, %p1954_p6 }
  0x4c   : > { %p1957_p9 = pnand %p1956_p2, %p1950_p12 }
  0x4e   : > { %1960 = shalt.err (!%p1957_p9)
}
  0x4f   : > { %s1961_s1 = scalar_lea.vmem %s2350_s15, 384  ;;  %s2141_s11 = smov [#allocation2]  }
  0x50   : > { %p1962_p11 = scmp.ne.s32.totalorder %s2350_s15, %s1961_s1  ;;  %s1966_s8 = sshll.u32 %s2141_s11, 4  ;;  %s1967_s8 = int_to_ptr.vmem [resolvable:$false] %s1966_s8 }
  0x51   : > { %s1968_s28 = scalar_lea.vmem %s1967_s8, 768  ;;  %p1969_p8 = scmp.lt.s32.totalorder %s2350_s15, %s1967_s8 }
  0x52   : > { %p1964_p3 = pnand %p1962_p11, %p1918_p7  ;;  %p1970_p5 = scmp.lt.s32.totalorder %s1968_s28, %s1961_s1 }
  0x54   : > { %p1965_p4 = pneg %p1964_p3  ;;  %p1971_p10 = por %p1970_p5, %p1969_p8 }
  0x56   : > { %p1972_p6 = pnand %p1971_p10, %p1965_p4 }
  0x58   : > { %1975 = shalt.err (!%p1972_p6)
}
  0x59   : > { %s2913_s26 = smov 8   ;;  %s2914_s6 = smov 128  }
  0x5a   : > { %1746 = dma.hbm_to_vmem [thread:$0]  (!%p2282_p1), %s2347_s7, 384, %s2350_s15, %s2354_s29, %s2914_s6, %s2914_s6, %s2913_s26  }
  0x5b   : > { %s108_s24 = sadd.s32 1, %s2104_s14  ;;  %p115_p8 = scmp.ne.s32.totalorder %s2104_s14, %s2100_s13 }
  0x5c   : > { %p2915_p7 = scmp.eq.s32.totalorder %s2260_s5, 0  ;;  %p2916_p12 = scmp.eq.s32.totalorder %s2136_s22, 0 }
  0x5d   : > { %p121_p2 = scmp.ne.s32.totalorder %s2100_s13, %s2096_s12  ;;  %s224_s25 = sand.u32 1, %s2104_s14  }
  0x5e   : > { %s2389_s27 = scalar_select %p2915_p7, %s2104_s14, %s108_s24  }
  0x5f   : > { %p117_p0 = por %p115_p8, %p2916_p12  ;;  %s1596_s9 = sshll.u32 %s2132_s21, 11 }
  0x60   : > { %p2917_p9 = scmp.eq.s32.totalorder %s2222_s23, 0  ;;  %s1532_s11 = sshll.u32 %s224_s25, 7 }
  0x61   : > { %s2406_s15 = scalar_lea.hbm %s2876_s2, %s1596_s9  ;;  %s226_s5 = scalar_lea.vmem [#allocation7], %s1532_s11 }
  0x62   : > { %p2399_p11 = por %p121_p2, %p2917_p9  ;;  %s235_s7 = sshll.u32 %s226_s5, 4  ;;  %s2414_s7 = int_to_ptr.vmem [resolvable:$true] %s235_s7 }
  0x63   : > { %p2919_p1 = scmp.lt.s32.totalorder %s2136_s22, 8  ;;  %s1976_s29 = scalar_lea.hbm %s2406_s15, 2048 }
  0x64   : > { %s2918_s1 = scalar_select %p2399_p11, 1, 0 }
  0x65   : > { %p2410_p3 = pnand %p2919_p1, %p117_p0  ;;  %p1977_p4 = scmp.ne.s32.totalorder %s2406_s15, %s1976_s29 }
  0x66   : > { %s1981_s9 = scalar_lea.hbm %s2876_s2, 4096  ;;  %p1982_p8 = scmp.lt.u32.totalorder %s2406_s15, %s2876_s2 }
  0x67   : > { %p1978_p5 = pneg %p2410_p3  ;;  %p1983_p7 = scmp.lt.u32.totalorder %s1981_s9, %s1976_s29 }
  0x68   : > { %p1985_p0 = scmp.lt.u32.totalorder %s1976_s29, %s2406_s15 }
  0x69   : > { %p1979_p10 = pnand %p1978_p5, %p1977_p4  ;;  %p1984_p12 = por %p1983_p7, %p1982_p8 }
  0x6b   : > { %p1980_p6 = pneg %p1979_p10  ;;  %p1986_p2 = por %p1985_p0, %p1984_p12 }
  0x6d   : > { %p1987_p9 = pnand %p1986_p2, %p1980_p6 }
  0x6f   : > { %1990 = shalt.err (!%p1987_p9)
}
  0x70   : > { %s1991_s28 = scalar_lea.vmem %s2414_s7, 2048  ;;  %s2142_s5 = smov [#allocation7]  }
  0x71   : > { %p1992_p1 = scmp.ne.s32.totalorder %s2414_s7, %s1991_s28  ;;  %s1996_s24 = sshll.u32 %s2142_s5, 4  ;;  %s1997_s24 = int_to_ptr.vmem [resolvable:$false] %s1996_s24 }
  0x72   : > { %s1998_s25 = scalar_lea.vmem %s1997_s24, 4096  ;;  %p1999_p11 = scmp.lt.s32.totalorder %s2414_s7, %s1997_s24 }
  0x73   : > { %p1994_p4 = pnand %p1992_p1, %p1978_p5  ;;  %p2000_p8 = scmp.lt.s32.totalorder %s1998_s25, %s1991_s28 }
  0x75   : > { %p1995_p10 = pneg %p1994_p4  ;;  %p2001_p7 = por %p2000_p8, %p1999_p11 }
  0x77   : > { %p2002_p12 = pnand %p2001_p7, %p1995_p10 }
  0x79   : > { %2005 = shalt.err (!%p2002_p12)
}
  0x7a   : > { %1752 = dma.hbm_to_vmem [thread:$0]  (!%p2410_p3), %s2406_s15, 2048, %s2414_s7, %s2303_s10, %s2914_s6, %s2914_s6, %s2913_s26  }
  0x7b   : > { %247 = sbr.rel (%p2338_p13) target bundleno = 944 (0x3b0), region = 32  ;;  %s2448_s29 = sand.u32 (!%p2338_p13), 1, %s2112_s16  }
  0x7c   : > { %s1734_s9 = smul.u32 (!%p2338_p13), 24, %s2448_s29  ;;  %s250_s11 = scalar_lea.sflag (!%p2338_p13), [#allocation3], %s2448_s29 }
  0x7d   : > { %p2921_p11 = scmp.ne.s32.totalorder (!%p2338_p13), %s2901_s30, 0 }
  0x7e   : > { %s253_s8 = scalar_lea.vmem (!%p2338_p13), [#allocation2], %s1734_s9 }
  0x82   : > { %2079 = dma.done.wait (%p2921_p11), %s250_s11, 384  }
  0x83   : > { %2081 = vsyncadd (%p2921_p11), %s250_s11, 4294966912  ;;  %s258_s10 = sand.u32 1, %s2222_s23   ;;  %s262_s20 = scalar_lea.vmem [#allocation5], %s1734_s9 }
  0x84   : > { %s259_s26 = scalar_lea.sflag [#allocation6], %s258_s10 }
  0x85   : > { %2083 = dma.done.wait (%p2921_p11), %s259_s26, 384  }
  0x86   : > { %2085 = vsyncadd (%p2921_p11), %s259_s26, 4294966912  ;;  %s269_s6 = sand.u32 1, %s2100_s13   ;;  %p2922_p13 = scmp.ne.s32.totalorder %s2918_s1, 0 }
  0x87   : > { %s1536_s15 = sshll.u32 %s269_s6, 7 }
  0x88   : > { %s2462_s7 = scalar_lea.vmem [#allocation7], %s1536_s15 }
  0x89   : > { %2087 = dma.done.wait (%p2922_p13), %s259_s26, 2048  }
  0x8a   : > { %2089 = vsyncadd (%p2922_p13), %s259_s26, 4294965248  ;;  %v322_v0 = vld [vmem:[%s253_s8] sm:$0xff]  ;;  %v1572_v1 = vld [vmem:[%s253_s8 + $0x10] sm:$0xff]  ;;  %vm356_vm0 = vcmask 64512   ;;  %s1537_s23 = sshll.u32 %s2448_s29, 7  ;;  %s1591_s1 = sshll.u32 %s2124_s19, 4 }
  0x8b   : > { %324 = vxpose.xlu0.b32.start.end [1/1] (short) %v322_v0, 128  ;;  %879 = vxpose.xlu1.b32.start.end [1/1] (short) %v1572_v1, 128  ;;  %v323_v2 = vld [vmem:[%s262_s20] sm:$0xff]  ;;  %v1555_v3 = vld [vmem:[%s262_s20 + $0x8] sm:$0xff]  ;;  %v1573_v4 = vld [vmem:[%s262_s20 + $0x10] sm:$0xff]  ;;  %s2770_s30 = scalar_lea.vmem [#allocation8], %s1537_s23  ;;  %s1592_s12 = sshll.u32 %s2120_s18, 5 }
  0x8c   : > { %1648 = vmatprep.subr.mxu0 %v323_v2  ;;  %1726 = vmatprep.subr.mxu1 %v323_v2  ;;  %v1554_v5 = vld [vmem:[%s253_s8 + $0x8] sm:$0xff]  ;;  %s1378_s28 = sadd.s32 %s1592_s12, %s1591_s1  ;;  %s1381_s24 = sshll.u32 %s2770_s30, 4  ;;  %s2809_s24 = int_to_ptr.vmem [resolvable:$true] %s1381_s24 }
  0x8d   : > { %1649 = vmatpush3.msra.mxu0 %v323_v2  ;;  %1727 = vmatpush3.msra.mxu1 %v323_v2  ;;  %s1593_s5 = sshll.u32 %s1378_s28, 7  ;;  %s1364_s18 = scalar_lea.sflag [#allocation4], %s2448_s29 }
  0x8e   : > { %1674 = vmatprep.subr.mxu1 %v1555_v3  ;;  %1700 = vmatprep.subr.mxu0 %v1573_v4  ;;  %s2807_s11 = scalar_lea.hbm %s2877_s3, %s1593_s5  ;;  %s2006_s19 = scalar_lea.vmem %s2809_s24, 2048 }
  0x8f   : > { %p2007_p3 = scmp.ne.s32.totalorder %s2809_s24, %s2006_s19  ;;  %p2923_p5 = scmp.ne.s32.totalorder %s2902_s4, 0 }
  0x90   : > { %s2143_s8 = smov [#allocation8]  }
  0x91   : > { %p2008_p6 = pnand %p2007_p3, %p2923_p5  ;;  %s2010_s10 = sshll.u32 %s2143_s8, 4  ;;  %s2011_s10 = int_to_ptr.vmem [resolvable:$false] %s2010_s10 }
  0x92   : > { %s2012_s26 = scalar_lea.vmem %s2011_s10, 4096  ;;  %p2013_p2 = scmp.lt.s32.totalorder %s2809_s24, %s2011_s10 }
  0x93   : > { %p2009_p0 = pneg %p2008_p6  ;;  %p2014_p9 = scmp.lt.s32.totalorder %s2012_s26, %s2006_s19 }
  0x95   : > { %p2015_p1 = por %p2014_p9, %p2013_p2 }
  0x97   : > { %p2016_p4 = pnand %p2015_p1, %p2009_p0 }
  0xc8   : > { %602 = vxpose.xlu0.b32.start.end [1/1] (short) %v1554_v5, 128 }
 0x10b   : > { %v340_v6 = vpop.trf.xlu0  ;;  %v895_v7 = vpop.trf.xlu1 }
 0x10c   : > { %1650 = vmatprep.mubr.msk.f32.mxu0 %vm356_vm0, %v340_v6 }
 0x10f   : > { %v341_v8 = vpop.trf.xlu0  ;;  %v896_v9 = vpop.trf.xlu1 }
 0x110   : > { %1651 = vmatmul.mubr.msk.f32.vlgmr.msra.gmra.mrb[0].mxu0 %vm356_vm0, %v341_v8 }
 0x111   : > { %1701 = vmatpush3.msra.mxu0 %v1573_v4 }
 0x113   : > { %v342_v10 = vpop.trf.xlu0  ;;  %v897_v11 = vpop.trf.xlu1 }
 0x114   : > { %1653 = vmatprep.mubr.msk.f32.mxu0 %vm356_vm0, %v342_v10 }
 0x117   : > { %v343_v12 = vpop.trf.xlu0  ;;  %v898_v13 = vpop.trf.xlu1 }
 0x118   : > { %1654 = vmatmul.mubr.msk.f32.gmra.mrb[2].mxu0 %vm356_vm0, %v343_v12 }
 0x11b   : > { %v344_v14 = vpop.trf.xlu0  ;;  %v899_v15 = vpop.trf.xlu1 }
 0x11c   : > { %1656 = vmatprep.mubr.msk.f32.mxu0 %vm356_vm0, %v344_v14 }
 0x11f   : > { %v345_v16 = vpop.trf.xlu0  ;;  %v900_v17 = vpop.trf.xlu1 }
 0x120   : > { %1657 = vmatmul.mubr.msk.f32.gmra.mrb[4].mxu0 %vm356_vm0, %v345_v16 }
 0x123   : > { %v346_v18 = vpop.trf.xlu0  ;;  %v901_v19 = vpop.trf.xlu1 }
 0x124   : > { %1659 = vmatprep.mubr.msk.f32.mxu0 %vm356_vm0, %v346_v18 }
 0x127   : > { %v347_v20 = vpop.trf.xlu0  ;;  %v902_v21 = vpop.trf.xlu1 }
 0x128   : > { %1660 = vmatmul.mubr.msk.f32.gmra.mrb[6].mxu0 %vm356_vm0, %v347_v20 }
 0x129   : > { %1702 = vmatprep.mubr.msk.f32.mxu0 %vm356_vm0, %v895_v7 }
 0x12b   : > { %v348_v22 = vpop.trf.xlu0  ;;  %v903_v23 = vpop.trf.xlu1 }
 0x12c   : > { %1662 = vmatprep.mubr.msk.f32.mxu1 %vm356_vm0, %v348_v22  ;;  %1703 = vmatmul.mubr.msk.f32.vlgmr.msra.gmra.mrb[8].mxu0 %vm356_vm0, %v896_v9  ;;  %v307_v22 = vld [vmem:[%s2462_s7 + $0x8] sm:$0xff] }
 0x12d   : > { %1705 = vmatprep.mubr.msk.f32.mxu0 %vm356_vm0, %v897_v11  ;;  %vm551_vm1 = vcmp.eq.s32.totalorder %v307_v22, 1  ;;  %vm828_vm2 = vcmp.eq.s32.totalorder %v307_v22, 2  ;;  %vm1105_vm3 = vcmp.eq.s32.totalorder %v307_v22, 3 }
 0x12f   : > { %v349_v24 = vpop.trf.xlu0  ;;  %v904_v25 = vpop.trf.xlu1 }
 0x130   : > { %1663 = vmatmul.mubr.msk.f32.vlgmr.msra.gmra.mrb[0].mxu1 %vm356_vm0, %v349_v24  ;;  %1706 = vmatmul.mubr.msk.f32.gmra.mrb[10].mxu0 %vm356_vm0, %v898_v13  ;;  %v1184_v24 = vlaneseq }
 0x131   : > { %1675 = vmatpush3.msra.mxu1 %v1555_v3  ;;  %1708 = vmatprep.mubr.msk.f32.mxu0 %vm356_vm0, %v899_v15 }
 0x133   : > { %v350_v26 = vpop.trf.xlu0  ;;  %v905_v27 = vpop.trf.xlu1 }
 0x134   : > { %1665 = vmatprep.mubr.msk.f32.mxu1 %vm356_vm0, %v350_v26  ;;  %1709 = vmatmul.mubr.msk.f32.gmra.mrb[12].mxu0 %vm356_vm0, %v900_v17 }
 0x135   : > { %1711 = vmatprep.mubr.msk.f32.mxu0 %vm356_vm0, %v901_v19 }
 0x137   : > { %v351_v28 = vpop.trf.xlu0  ;;  %v906_v29 = vpop.trf.xlu1 }
 0x138   : > { %1666 = vmatmul.mubr.msk.f32.gmra.mrb[2].mxu1 %vm356_vm0, %v351_v28  ;;  %1712 = vmatmul.mubr.msk.f32.gmra.mrb[14].mxu0 %vm356_vm0, %v902_v21 }
 0x139   : > { %1714 = vmatprep.mubr.msk.f32.mxu0 %vm356_vm0, %v903_v23  ;;  %v306_v23 = vld [vmem:[%s2462_s7] sm:$0xff] }
 0x13a   : > { %vm550_vm4 = vcmp.eq.s32.totalorder %v306_v23, 1  ;;  %vm827_vm5 = vcmp.eq.s32.totalorder %v306_v23, 2  ;;  %vm1104_vm6 = vcmp.eq.s32.totalorder %v306_v23, 3 }
 0x13b   : > { %v352_v30 = vpop.trf.xlu0  ;;  %v907_v31 = vpop.trf.xlu1 }
 0x13c   : > { %1668 = vmatprep.mubr.msk.f32.mxu1 %vm356_vm0, %v352_v30  ;;  %1715 = vmatmul.mubr.msk.f32.gmra.mrb[16].mxu0 %vm356_vm0, %v904_v25  ;;  %v2572_v30 = vand.u32 127, %v1184_v24 }
 0x13d   : > { %1717 = vmatprep.mubr.msk.f32.mxu0 %vm356_vm0, %v905_v27 }
 0x13e   : > { %vm1186_vm8 = vcmp.lt.s32.totalorder %v2572_v30, 8 }
 0x13f   : > { %v353_v32 = vpop.trf.xlu0  ;;  %v908_v33 = vpop.trf.xlu1 }
 0x140   : > { %1669 = vmatmul.mubr.msk.f32.gmra.mrb[4].mxu1 %vm356_vm0, %v353_v32  ;;  %1718 = vmatmul.mubr.msk.f32.gmra.mrb[18].mxu0 %vm356_vm0, %v906_v29  ;;  %v309_v32 = vld [vmem:[%s2462_s7 + $0x18] sm:$0xff] }
 0x141   : > { %1720 = vmatprep.mubr.msk.f32.mxu0 %vm356_vm0, %v907_v31  ;;  %vm553_vm7 = vcmp.eq.s32.totalorder %v309_v32, 1  ;;  %vm830_vm10 = vcmp.eq.s32.totalorder %v309_v32, 2  ;;  %vm1107_vm11 = vcmp.eq.s32.totalorder %v309_v32, 3  ;;  %v312_v32 = vld [vmem:[%s2462_s7 + $0x30] sm:$0xff] }
 0x143   : > { %v354_v34 = vpop.trf.xlu0  ;;  %v909_v35 = vpop.trf.xlu1 }
 0x144   : > { %1671 = vmatprep.mubr.msk.f32.mxu1 %vm356_vm0, %v354_v34  ;;  %1721 = vmatmul.mubr.msk.f32.gmra.mrb[20].mxu0 %vm356_vm0, %v908_v33 }
 0x145   : > { %1723 = vmatprep.mubr.msk.f32.mxu0 %vm356_vm0, %v909_v35 }
 0x147   : > { %v355_v36 = vpop.trf.xlu0  ;;  %v910_v37 = vpop.trf.xlu1 }
 0x148   : > { %1672 = vmatmul.mubr.msk.f32.gmra.mrb[6].mxu1 %vm356_vm0, %v355_v36  ;;  %1724 = vmatmul.mubr.msk.f32.gmra.mrb[22].mxu0 %vm356_vm0, %v910_v37  ;;  %v308_v36 = vld [vmem:[%s2462_s7 + $0x10] sm:$0xff] }
 0x149   : > { %vm552_vm9 = vcmp.eq.s32.totalorder %v308_v36, 1  ;;  %vm829_vm13 = vcmp.eq.s32.totalorder %v308_v36, 2  ;;  %vm1106_vm14 = vcmp.eq.s32.totalorder %v308_v36, 3 }
 0x14b   : > { %v618_v38 = vpop.trf.xlu0 }
 0x14c   : > { %1676 = vmatprep.mubr.msk.f32.mxu1 %vm356_vm0, %v618_v38 }
 0x14f   : > { %v619_v39 = vpop.trf.xlu0 }
 0x150   : > { %1677 = vmatmul.mubr.msk.f32.vlgmr.msra.gmra.mrb[8].mxu1 %vm356_vm0, %v619_v39 }
 0x153   : > { %v620_v40 = vpop.trf.xlu0 }
 0x154   : > { %1679 = vmatprep.mubr.msk.f32.mxu1 %vm356_vm0, %v620_v40 }
 0x157   : > { %v621_v41 = vpop.trf.xlu0 }
 0x158   : > { %1680 = vmatmul.mubr.msk.f32.gmra.mrb[10].mxu1 %vm356_vm0, %v621_v41 }
 0x15b   : > { %v622_v42 = vpop.trf.xlu0 }
 0x15c   : > { %1682 = vmatprep.mubr.msk.f32.mxu1 %vm356_vm0, %v622_v42 }
 0x15f   : > { %v623_v43 = vpop.trf.xlu0 }
 0x160   : > { %1683 = vmatmul.mubr.msk.f32.gmra.mrb[12].mxu1 %vm356_vm0, %v623_v43 }
 0x163   : > { %v624_v44 = vpop.trf.xlu0 }
 0x164   : > { %1685 = vmatprep.mubr.msk.f32.mxu1 %vm356_vm0, %v624_v44 }
 0x167   : > { %v625_v45 = vpop.trf.xlu0 }
 0x168   : > { %1686 = vmatmul.mubr.msk.f32.gmra.mrb[14].mxu1 %vm356_vm0, %v625_v45 }
 0x16b   : > { %v626_v46 = vpop.trf.xlu0 }
 0x16c   : > { %1688 = vmatprep.mubr.msk.f32.mxu1 %vm356_vm0, %v626_v46 }
 0x16f   : > { %v627_v47 = vpop.trf.xlu0 }
 0x170   : > { %1689 = vmatmul.mubr.msk.f32.gmra.mrb[16].mxu1 %vm356_vm0, %v627_v47 }
 0x173   : > { %v628_v48 = vpop.trf.xlu0 }
 0x174   : > { %1691 = vmatprep.mubr.msk.f32.mxu1 %vm356_vm0, %v628_v48 }
 0x177   : > { %v629_v49 = vpop.trf.xlu0 }
 0x178   : > { %1692 = vmatmul.mubr.msk.f32.gmra.mrb[18].mxu1 %vm356_vm0, %v629_v49 }
 0x17b   : > { %v630_v50 = vpop.trf.xlu0 }
 0x17c   : > { %1694 = vmatprep.mubr.msk.f32.mxu1 %vm356_vm0, %v630_v50  ;;  %v311_v50 = vld [vmem:[%s2462_s7 + $0x28] sm:$0xff] }
 0x17f   : > { %v631_v51 = vpop.trf.xlu0 }
 0x180   : > { %1695 = vmatmul.mubr.msk.f32.gmra.mrb[20].mxu1 %vm356_vm0, %v631_v51 }
 0x183   : > { %v632_v52 = vpop.trf.xlu0 }
 0x184   : > { %1697 = vmatprep.mubr.msk.f32.mxu1 %vm356_vm0, %v632_v52 }
 0x187   : > { %v633_v53 = vpop.trf.xlu0 }
 0x188   : > { %1698 = vmatmul.mubr.msk.f32.gmra.mrb[22].mxu1 %vm356_vm0, %v633_v53  ;;  %vm555_vm0 = vcmp.eq.s32.totalorder %v311_v50, 1 }
 0x1e3   : > { %v1652_v54 = vpop.f32.mrb[0].mxu0 }
 0x1e4   : > { %v471_v55 = vpop.f32.mrb[1].mxu0  ;;  %v567_v26 = vsel %vm551_vm1, %v1652_v54, 0.0  ;;  %v310_v54 = vld [vmem:[%s2462_s7 + $0x20] sm:$0xff] }
 0x1e5   : > { %v566_v31 = vsel %vm550_vm4, %v471_v55, 0.0  ;;  %vm554_vm1 = vcmp.eq.s32.totalorder %v310_v54, 1 }
 0x1eb   : > { %v2516_v56 = vpop.f32.mrb[2].mxu0 }
 0x1ec   : > { %v2518_v57 = vpop.f32.mrb[3].mxu0  ;;  %v569_v44 = vsel %vm553_vm7, %v2516_v56, 0.0 }
 0x1ed   : > { %v568_v49 = vsel %vm552_vm9, %v2518_v57, 0.0 }
 0x1f3   : > { %v2520_v58 = vpop.f32.mrb[4].mxu0 }
 0x1f4   : > { %v2522_v59 = vpop.f32.mrb[5].mxu0 }
 0x1fb   : > { %v2524_v60 = vpop.f32.mrb[6].mxu0 }
 0x1fc   : > { %v2526_v61 = vpop.f32.mrb[7].mxu0 }
 0x1ff   : > { %v1704_v62 = vpop.f32.mrb[8].mxu0 }
 0x200   : > { %v1025_v63 = vpop.f32.mrb[9].mxu0  ;;  %v1121_v29 = vsel %vm1105_vm3, %v1704_v62, 0.0  ;;  %vm1109_vm3 = vcmp.eq.s32.totalorder %v311_v50, 3 }
 0x201   : > { %v1120_v35 = vsel %vm1104_vm6, %v1025_v63, 0.0  ;;  %vm1108_vm6 = vcmp.eq.s32.totalorder %v310_v54, 3 }
 0x203   : > { %v2528_v0 = vpop.f32.mrb[0].mxu1  ;;  %v1707_v1 = vpop.f32.mrb[10].mxu0 }
 0x204   : > { %v2530_v2 = vpop.f32.mrb[1].mxu1  ;;  %v2532_v3 = vpop.f32.mrb[11].mxu0  ;;  %v1123_v47 = vsel %vm1107_vm11, %v1707_v1, 0.0 }
 0x205   : > { %v1122_v53 = vsel %vm1106_vm14, %v2532_v3, 0.0  ;;  %v571_v3 = vsel %vm555_vm0, %v2520_v58, 0.0  ;;  %vm833_vm14 = vcmp.eq.s32.totalorder %v312_v32, 2 }
 0x207   : > { %v2534_v4 = vpop.f32.mrb[12].mxu0 }
 0x208   : > { %v2536_v5 = vpop.f32.mrb[13].mxu0  ;;  %v1125_v24 = vsel %vm1109_vm3, %v2534_v4, 0.0 }
 0x20b   : > { %v2538_v6 = vpop.f32.mrb[2].mxu1  ;;  %v2540_v7 = vpop.f32.mrb[14].mxu0 }
 0x20c   : > { %v2542_v8 = vpop.f32.mrb[3].mxu1  ;;  %v2544_v9 = vpop.f32.mrb[15].mxu0 }
 0x20f   : > { %v2546_v10 = vpop.f32.mrb[16].mxu0 }
 0x210   : > { %v2548_v11 = vpop.f32.mrb[17].mxu0 }
 0x213   : > { %v2550_v12 = vpop.f32.mrb[4].mxu1  ;;  %v2552_v13 = vpop.f32.mrb[18].mxu0 }
 0x214   : > { %v2554_v14 = vpop.f32.mrb[5].mxu1  ;;  %v2556_v15 = vpop.f32.mrb[19].mxu0 }
 0x217   : > { %v2558_v16 = vpop.f32.mrb[20].mxu0 }
 0x218   : > { %v2560_v17 = vpop.f32.mrb[21].mxu0 }
 0x21b   : > { %v2562_v18 = vpop.f32.mrb[6].mxu1  ;;  %v2564_v19 = vpop.f32.mrb[22].mxu0 }
 0x21c   : > { %v2566_v20 = vpop.f32.mrb[7].mxu1  ;;  %v2568_v21 = vpop.f32.mrb[23].mxu0 }
 0x223   : > { %v1678_v25 = vpop.f32.mrb[8].mxu1 }
 0x224   : > { %v844_v27 = vsel %vm828_vm2, %v1678_v25, 0.0  ;;  %v748_v28 = vpop.f32.mrb[9].mxu1  ;;  %vm832_vm2 = vcmp.eq.s32.totalorder %v311_v50, 2 }
 0x225   : > { %v860_v33 = vadd.f32 %v844_v27, %v567_v26  ;;  %v843_v34 = vsel %vm827_vm5, %v748_v28, 0.0  ;;  %vm831_vm5 = vcmp.eq.s32.totalorder %v310_v54, 2  ;;  %v570_v26 = vsel %vm554_vm1, %v2522_v59, 0.0  ;;  %v313_v27 = vld [vmem:[%s2462_s7 + $0x38] sm:$0xff] }
 0x226   : > { %v859_v37 = vadd.f32 %v843_v34, %v566_v31  ;;  %v1124_v31 = vsel %vm1108_vm6, %v2536_v5, 0.0  ;;  %vm557_vm9 = vcmp.eq.s32.totalorder %v313_v27, 1  ;;  %vm834_vm11 = vcmp.eq.s32.totalorder %v313_v27, 2 }
 0x227   : > { %v1137_v38 = vadd.f32 %v1121_v29, %v860_v33  ;;  %v573_v36 = vsel %vm557_vm9, %v2524_v60, 0.0 }
 0x228   : > { %v1136_v39 = vadd.f32 %v1120_v35, %v859_v37 }
 0x229   : > { %vm1153_vm12 = vcmp.eq.f32.partialorder %v1137_v38, 0.0 }
 0x22a   : > { %v1169_v40 = vsel %vm1153_vm12, -1e+09, %v1137_v38  ;;  %vm1152_vm15 = vcmp.eq.f32.partialorder %v1136_v39, 0.0  ;;  %vm1111_vm12 = vcmp.eq.s32.totalorder %v313_v27, 3 }
 0x22b   : > { %v1681_v41 = vpop.f32.mrb[10].mxu1  ;;  %v2579_v42 = vsel %vm1186_vm8, %v1169_v40, -1e+30  ;;  %v1168_v43 = vsel %vm1152_vm15, -1e+09, %v1136_v39  ;;  %vm1110_vm15 = vcmp.eq.s32.totalorder %v312_v32, 3 }
 0x22c   : > { %v846_v45 = vsel %vm830_vm10, %v1681_v41, 0.0  ;;  %v758_v46 = vpop.f32.mrb[11].mxu1  ;;  %1205 = vmax.xlane.f32.xlu0 %v2579_v42  ;;  %v2585_v48 = vsel %vm1186_vm8, %v1168_v43, -1e+30  ;;  %vm556_vm10 = vcmp.eq.s32.totalorder %v312_v32, 1  ;;  %v1127_v39 = vsel %vm1111_vm12, %v2540_v7, 0.0 }
 0x22d   : > { %v862_v51 = vadd.f32 %v846_v45, %v569_v44  ;;  %v845_v52 = vsel %vm829_vm13, %v758_v46, 0.0  ;;  %1203 = vmax.xlane.f32.xlu1 %v2585_v48  ;;  %v572_v41 = vsel %vm556_vm10, %v2526_v61, 0.0  ;;  %v315_v43 = vld [vmem:[%s2462_s7 + $0x48] sm:$0xff]  ;;  %v1126_v46 = vsel %vm1110_vm15, %v2544_v9, 0.0 }
 0x22e   : > { %v861_v55 = vadd.f32 %v845_v52, %v568_v49  ;;  %vm559_vm1 = vcmp.eq.s32.totalorder %v315_v43, 1  ;;  %vm836_vm3 = vcmp.eq.s32.totalorder %v315_v43, 2 }
 0x22f   : > { %v1139_v56 = vadd.f32 %v1123_v47, %v862_v51  ;;  %v314_v47 = vld [vmem:[%s2462_s7 + $0x40] sm:$0xff]  ;;  %v575_v52 = vsel %vm559_vm1, %v2528_v0, 0.0 }
 0x230   : > { %v1138_v62 = vadd.f32 %v1122_v53, %v861_v55  ;;  %vm835_vm6 = vcmp.eq.s32.totalorder %v314_v47, 2 }
 0x231   : > { %vm1155_vm4 = vcmp.eq.f32.partialorder %v1139_v56, 0.0 }
 0x232   : > { %v1171_v57 = vsel %vm1155_vm4, -1e+09, %v1139_v56  ;;  %vm1154_vm7 = vcmp.eq.f32.partialorder %v1138_v62, 0.0  ;;  %vm1113_vm4 = vcmp.eq.s32.totalorder %v315_v43, 3 }
 0x233   : > { %v1684_v63 = vpop.f32.mrb[12].mxu1  ;;  %v2596_v1 = vsel %vm1186_vm8, %v1171_v57, -1e+30  ;;  %v1170_v25 = vsel %vm1154_vm7, -1e+09, %v1138_v62  ;;  %vm1112_vm7 = vcmp.eq.s32.totalorder %v314_v47, 3 }
 0x234   : > { %v848_v22 = vsel %vm832_vm2, %v1684_v63, 0.0  ;;  %v768_v23 = vpop.f32.mrb[13].mxu1  ;;  %1209 = vmax.xlane.f32.xlu1 %v2596_v1  ;;  %v2608_v58 = vsel %vm1186_vm8, %v1170_v25, -1e+30  ;;  %vm558_vm2 = vcmp.eq.s32.totalorder %v314_v47, 1  ;;  %v1129_v55 = vsel %vm1113_vm4, %v2546_v10, 0.0 }
 0x235   : > { %v864_v28 = vadd.f32 %v848_v22, %v571_v3  ;;  %v847_v29 = vsel %vm831_vm5, %v768_v23, 0.0  ;;  %v574_v62 = vsel %vm558_vm2, %v2530_v2, 0.0  ;;  %v317_v57 = vld [vmem:[%s2462_s7 + $0x58] sm:$0xff]  ;;  %v1128_v22 = vsel %vm1112_vm7, %v2548_v11, 0.0  ;;  %v316_v23 = vld [vmem:[%s2462_s7 + $0x50] sm:$0xff] }
 0x236   : > { %v863_v33 = vadd.f32 %v847_v29, %v570_v26  ;;  %vm561_vm10 = vcmp.eq.s32.totalorder %v317_v57, 1  ;;  %vm838_vm12 = vcmp.eq.s32.totalorder %v317_v57, 2  ;;  %vm837_vm15 = vcmp.eq.s32.totalorder %v316_v23, 2  ;;  %v321_v47 = vld [vmem:[%s2462_s7 + $0x78] sm:$0xff] }
 0x237   : > { %v1141_v34 = vadd.f32 %v1125_v24, %v864_v28  ;;  %v577_v27 = vsel %vm561_vm10, %v2538_v6, 0.0 }
 0x238   : > { %v1140_v4 = vadd.f32 %v1124_v31, %v863_v33  ;;  %1207 = vmax.xlane.f32.xlu1 %v2608_v58 }
 0x239   : > { %vm1157_vm13 = vcmp.eq.f32.partialorder %v1141_v34, 0.0 }
 0x23a   : > { %v1173_v59 = vsel %vm1157_vm13, -1e+09, %v1141_v34  ;;  %vm1156_vm0 = vcmp.eq.f32.partialorder %v1140_v4, 0.0  ;;  %vm1115_vm13 = vcmp.eq.s32.totalorder %v317_v57, 3  ;;  %v319_v34 = vld [vmem:[%s2462_s7 + $0x68] sm:$0xff] }
 0x23b   : > { %v1687_v5 = vpop.f32.mrb[14].mxu1  ;;  %v2613_v35 = vsel %vm1186_vm8, %v1173_v59, -1e+30  ;;  %v1172_v40 = vsel %vm1156_vm0, -1e+09, %v1140_v4  ;;  %vm1114_vm0 = vcmp.eq.s32.totalorder %v316_v23, 3 }
 0x23c   : > { %v850_v37 = vsel %vm834_vm11, %v1687_v5, 0.0  ;;  %v778_v38 = vpop.f32.mrb[15].mxu1  ;;  %1213 = vmax.xlane.f32.xlu1 %v2613_v35  ;;  %v2625_v60 = vsel %vm1186_vm8, %v1172_v40, -1e+30  ;;  %vm560_vm11 = vcmp.eq.s32.totalorder %v316_v23, 1  ;;  %v1131_v31 = vsel %vm1115_vm13, %v2552_v13, 0.0 }
 0x23d   : > { %v866_v44 = vadd.f32 %v850_v37, %v573_v36  ;;  %v849_v45 = vsel %vm833_vm14, %v778_v38, 0.0  ;;  %v576_v33 = vsel %vm560_vm11, %v2542_v8, 0.0  ;;  %v1130_v5 = vsel %vm1114_vm0, %v2556_v15, 0.0  ;;  %v318_v36 = vld [vmem:[%s2462_s7 + $0x60] sm:$0xff] }
 0x23e   : > { %v865_v49 = vadd.f32 %v849_v45, %v572_v41  ;;  %vm563_vm2 = vcmp.eq.s32.totalorder %v319_v34, 1  ;;  %vm840_vm4 = vcmp.eq.s32.totalorder %v319_v34, 2  ;;  %vm839_vm7 = vcmp.eq.s32.totalorder %v318_v36, 2 }
 0x23f   : > { %v1143_v50 = vadd.f32 %v1127_v39, %v866_v44  ;;  %v579_v40 = vsel %vm563_vm2, %v2550_v12, 0.0  ;;  %vm565_vm11 = vcmp.eq.s32.totalorder %v321_v47, 1  ;;  %vm842_vm13 = vcmp.eq.s32.totalorder %v321_v47, 2 }
 0x240   : > { %v1142_v7 = vadd.f32 %v1126_v46, %v865_v49  ;;  %1211 = vmax.xlane.f32.xlu1 %v2625_v60 }
 0x241   : > { %vm1159_vm5 = vcmp.eq.f32.partialorder %v1143_v50, 0.0 }
 0x242   : > { %v1175_v61 = vsel %vm1159_vm5, -1e+09, %v1143_v50  ;;  %vm1158_vm9 = vcmp.eq.f32.partialorder %v1142_v7, 0.0  ;;  %vm1117_vm5 = vcmp.eq.s32.totalorder %v319_v34, 3 }
 0x243   : > { %v1690_v9 = vpop.f32.mrb[16].mxu1  ;;  %v2630_v51 = vsel %vm1186_vm8, %v1175_v61, -1e+30  ;;  %v1174_v56 = vsel %vm1158_vm9, -1e+09, %v1142_v7  ;;  %vm1116_vm9 = vcmp.eq.s32.totalorder %v318_v36, 3 }
 0x244   : > { %v852_v53 = vsel %vm836_vm3, %v1690_v9, 0.0  ;;  %v788_v54 = vpop.f32.mrb[17].mxu1  ;;  %1217 = vmax.xlane.f32.xlu1 %v2630_v51  ;;  %v2642_v0 = vsel %vm1186_vm8, %v1174_v56, -1e+30  ;;  %vm562_vm3 = vcmp.eq.s32.totalorder %v318_v36, 1  ;;  %v1133_v44 = vsel %vm1117_vm5, %v2558_v16, 0.0 }
 0x245   : > { %v868_v63 = vadd.f32 %v852_v53, %v575_v52  ;;  %v851_v3 = vsel %vm835_vm6, %v788_v54, 0.0  ;;  %v578_v46 = vsel %vm562_vm3, %v2554_v14, 0.0  ;;  %v1132_v7 = vsel %vm1116_vm9, %v2560_v17, 0.0  ;;  %v320_v61 = vld [vmem:[%s2462_s7 + $0x70] sm:$0xff] }
 0x246   : > { %v867_v24 = vadd.f32 %v851_v3, %v574_v62  ;;  %vm841_vm0 = vcmp.eq.s32.totalorder %v320_v61, 2  ;;  %v581_v54 = vsel %vm565_vm11, %v2562_v18, 0.0 }
 0x247   : > { %v1145_v25 = vadd.f32 %v1129_v55, %v868_v63 }
 0x248   : > { %v1144_v10 = vadd.f32 %v1128_v22, %v867_v24  ;;  %1215 = vmax.xlane.f32.xlu1 %v2642_v0 }
 0x249   : > { %vm1161_vm14 = vcmp.eq.f32.partialorder %v1145_v25, 0.0 }
 0x24a   : > { %v1177_v2 = vsel %vm1161_vm14, -1e+09, %v1145_v25  ;;  %vm1160_vm1 = vcmp.eq.f32.partialorder %v1144_v10, 0.0  ;;  %vm1119_vm14 = vcmp.eq.s32.totalorder %v321_v47, 3 }
 0x24b   : > { %v1693_v11 = vpop.f32.mrb[18].mxu1  ;;  %v2647_v26 = vsel %vm1186_vm8, %v1177_v2, -1e+30  ;;  %v1176_v32 = vsel %vm1160_vm1, -1e+09, %v1144_v10  ;;  %vm1118_vm1 = vcmp.eq.s32.totalorder %v320_v61, 3 }
 0x24c   : > { %v854_v28 = vsel %vm838_vm12, %v1693_v11, 0.0  ;;  %v798_v29 = vpop.f32.mrb[19].mxu1  ;;  %1221 = vmax.xlane.f32.xlu1 %v2647_v26  ;;  %v2659_v6 = vsel %vm1186_vm8, %v1176_v32, -1e+30  ;;  %vm564_vm12 = vcmp.eq.s32.totalorder %v320_v61, 1  ;;  %v1135_v62 = vsel %vm1119_vm14, %v2564_v19, 0.0 }
 0x24d   : > { %v870_v4 = vadd.f32 %v854_v28, %v577_v27  ;;  %v853_v59 = vsel %vm837_vm15, %v798_v29, 0.0  ;;  %v580_v63 = vsel %vm564_vm12, %v2566_v20, 0.0  ;;  %v1134_v23 = vsel %vm1118_vm1, %v2568_v21, 0.0 }
 0x24e   : > { %v869_v37 = vadd.f32 %v853_v59, %v576_v33 }
 0x24f   : > { %v1147_v38 = vadd.f32 %v1131_v31, %v870_v4 }
 0x250   : > { %v1146_v13 = vadd.f32 %v1130_v5, %v869_v37  ;;  %1219 = vmax.xlane.f32.xlu1 %v2659_v6 }
 0x251   : > { %vm1163_vm6 = vcmp.eq.f32.partialorder %v1147_v38, 0.0 }
 0x252   : > { %v1179_v8 = vsel %vm1163_vm6, -1e+09, %v1147_v38  ;;  %vm1162_vm10 = vcmp.eq.f32.partialorder %v1146_v13, 0.0 }
 0x253   : > { %v1696_v15 = vpop.f32.mrb[20].mxu1  ;;  %v2664_v39 = vsel %vm1186_vm8, %v1179_v8, -1e+30  ;;  %v1178_v45 = vsel %vm1162_vm10, -1e+09, %v1146_v13 }
 0x254   : > { %v856_v41 = vsel %vm840_vm4, %v1696_v15, 0.0  ;;  %v808_v43 = vpop.f32.mrb[21].mxu1  ;;  %1225 = vmax.xlane.f32.xlu1 %v2664_v39  ;;  %v2676_v12 = vsel %vm1186_vm8, %v1178_v45, -1e+30 }
 0x255   : > { %v872_v49 = vadd.f32 %v856_v41, %v579_v40  ;;  %v855_v50 = vsel %vm839_vm7, %v808_v43, 0.0 }
 0x256   : > { %v871_v9 = vadd.f32 %v855_v50, %v578_v46 }
 0x257   : > { %v1149_v52 = vadd.f32 %v1133_v44, %v872_v49 }
 0x258   : > { %v1148_v16 = vadd.f32 %v1132_v7, %v871_v9  ;;  %1223 = vmax.xlane.f32.xlu1 %v2676_v12 }
 0x259   : > { %vm1165_vm15 = vcmp.eq.f32.partialorder %v1149_v52, 0.0 }
 0x25a   : > { %v1181_v14 = vsel %vm1165_vm15, -1e+09, %v1149_v52  ;;  %vm1164_vm2 = vcmp.eq.f32.partialorder %v1148_v16, 0.0 }
 0x25b   : > { %v1699_v17 = vpop.f32.mrb[22].mxu1  ;;  %v2681_v53 = vsel %vm1186_vm8, %v1181_v14, -1e+30  ;;  %v1180_v57 = vsel %vm1164_vm2, -1e+09, %v1148_v16 }
 0x25c   : > { %v858_v55 = vsel %vm842_vm13, %v1699_v17, 0.0  ;;  %v818_v56 = vpop.f32.mrb[23].mxu1  ;;  %1229 = vmax.xlane.f32.xlu1 %v2681_v53  ;;  %v2691_v10 = vsel %vm1186_vm8, %v1180_v57, -1e+30 }
 0x25d   : > { %v874_v3 = vadd.f32 %v858_v55, %v581_v54  ;;  %v857_v22 = vsel %vm841_vm0, %v818_v56, 0.0 }
 0x25e   : > { %v873_v24 = vadd.f32 %v857_v22, %v580_v63 }
 0x25f   : > { %v1151_v25 = vadd.f32 %v1135_v62, %v874_v3 }
 0x260   : > { %v1150_v18 = vadd.f32 %v1134_v23, %v873_v24  ;;  %1227 = vmax.xlane.f32.xlu1 %v2691_v10 }
 0x261   : > { %vm1167_vm4 = vcmp.eq.f32.partialorder %v1151_v25, 0.0 }
 0x262   : > { %vm1166_vm3 = vcmp.eq.f32.partialorder %v1150_v18, 0.0  ;;  %v1183_v20 = vsel %vm1167_vm4, -1e+09, %v1151_v25 }
 0x263   : > { %v1182_v19 = vsel %vm1166_vm3, -1e+09, %v1150_v18  ;;  %v2701_v21 = vsel %vm1186_vm8, %v1183_v20, -1e+30 }
 0x264   : > { %v2696_v2 = vsel %vm1186_vm8, %v1182_v19, -1e+30 }
 0x265   : > { %1231 = vmax.xlane.f32.xlu1 %v2696_v2 }
 0x269   : > { %1233 = vmax.xlane.f32.xlu1 %v2701_v21 }
 0x2b9   : > { %v1206_v11 = vpop.xlane.xlu0 %1205 }
 0x2ba   : > { %v1236_v27 = vsub.f32 %v2579_v42, %v1206_v11  ;;  %v1204_v28 = vpop.xlane.xlu1 %1203 }
 0x2bb   : > { %v1235_v29 = vsub.f32 %v2585_v48, %v1204_v28 }
 0x2bc   : > { %v1253_v31 = vmul.f32 1.442695, %v1236_v27 }
 0x2bd   : > { %v1251_v32 = vmul.f32 1.442695, %v1235_v29 }
 0x2be   : > { %1852 = vpow2.f32 %v1253_v31 }
 0x2bf   : > { %1854 = vpow2.f32 %v1251_v32 }
 0x2c1   : > { %v1210_v33 = vpop.xlane.xlu1 %1209 }
 0x2c2   : > { %v1238_v34 = vsub.f32 %v2596_v1, %v1210_v33 }
 0x2c4   : > { %v1257_v4 = vmul.f32 1.442695, %v1238_v34 }
 0x2c5   : > { %v1208_v59 = vpop.xlane.xlu1 %1207 }
 0x2c6   : > { %1856 = vpow2.f32 %v1257_v4  ;;  %v1237_v30 = vsub.f32 %v2608_v58, %v1208_v59 }
 0x2c8   : > { %v2708_v5 = vpop.eup %1852  ;;  %v1255_v36 = vmul.f32 1.442695, %v1237_v30 }
 0x2c9   : > { %1285 = vadd.xlane.f32.xlu1 %v2708_v5  ;;  %v1214_v42 = vpop.xlane.xlu1 %1213  ;;  %v2712_v37 = vpop.eup %1854 }
 0x2ca   : > { %1858 = vpow2.f32 %v1255_v36  ;;  %v1240_v48 = vsub.f32 %v2613_v35, %v1214_v42 }
 0x2cc   : > { %v1261_v38 = vmul.f32 1.442695, %v1240_v48 }
 0x2cd   : > { %1283 = vadd.xlane.f32.xlu1 %v2712_v37  ;;  %v1212_v1 = vpop.xlane.xlu1 %1211 }
 0x2ce   : > { %1860 = vpow2.f32 %v1261_v38  ;;  %v1239_v13 = vsub.f32 %v2625_v60, %v1212_v1 }
 0x2d0   : > { %v2716_v8 = vpop.eup %1856  ;;  %v1259_v58 = vmul.f32 1.442695, %v1239_v13 }
 0x2d1   : > { %1289 = vadd.xlane.f32.xlu0 %v2716_v8  ;;  %v1218_v15 = vpop.xlane.xlu1 %1217 }
 0x2d2   : > { %1862 = vpow2.f32 %v1259_v58  ;;  %v1242_v40 = vsub.f32 %v2630_v51, %v1218_v15 }
 0x2d4   : > { %v2720_v41 = vpop.eup %1858  ;;  %v1265_v35 = vmul.f32 1.442695, %v1242_v40 }
 0x2d5   : > { %1287 = vadd.xlane.f32.xlu1 %v2720_v41  ;;  %v1216_v43 = vpop.xlane.xlu1 %1215 }
 0x2d6   : > { %1864 = vpow2.f32 %v1265_v35  ;;  %v1241_v44 = vsub.f32 %v2642_v0, %v1216_v43 }
 0x2d8   : > { %v2724_v45 = vpop.eup %1860  ;;  %v1263_v60 = vmul.f32 1.442695, %v1241_v44 }
 0x2d9   : > { %1293 = vadd.xlane.f32.xlu0 %v2724_v45  ;;  %v1222_v46 = vpop.xlane.xlu1 %1221 }
 0x2da   : > { %1866 = vpow2.f32 %v1263_v60  ;;  %v1244_v47 = vsub.f32 %v2647_v26, %v1222_v46 }
 0x2dc   : > { %v2728_v49 = vpop.eup %1862  ;;  %v1269_v51 = vmul.f32 1.442695, %v1244_v47 }
 0x2dd   : > { %1291 = vadd.xlane.f32.xlu1 %v2728_v49  ;;  %v1220_v50 = vpop.xlane.xlu1 %1219 }
 0x2de   : > { %1868 = vpow2.f32 %v1269_v51  ;;  %v1243_v7 = vsub.f32 %v2659_v6, %v1220_v50 }
 0x2e0   : > { %v2732_v61 = vpop.eup %1864  ;;  %v1267_v0 = vmul.f32 1.442695, %v1243_v7 }
 0x2e1   : > { %1297 = vadd.xlane.f32.xlu0 %v2732_v61  ;;  %v1226_v9 = vpop.xlane.xlu1 %1225 }
 0x2e2   : > { %1870 = vpow2.f32 %v1267_v0  ;;  %v1246_v52 = vsub.f32 %v2664_v39, %v1226_v9 }
 0x2e4   : > { %v2736_v16 = vpop.eup %1866  ;;  %v1273_v26 = vmul.f32 1.442695, %v1246_v52 }
 0x2e5   : > { %1295 = vadd.xlane.f32.xlu1 %v2736_v16  ;;  %v1224_v14 = vpop.xlane.xlu1 %1223 }
 0x2e6   : > { %1872 = vpow2.f32 %v1273_v26  ;;  %v1245_v17 = vsub.f32 %v2676_v12, %v1224_v14 }
 0x2e8   : > { %v2740_v54 = vpop.eup %1868  ;;  %v1271_v6 = vmul.f32 1.442695, %v1245_v17 }
 0x2e9   : > { %1301 = vadd.xlane.f32.xlu0 %v2740_v54  ;;  %v1230_v55 = vpop.xlane.xlu1 %1229 }
 0x2ea   : > { %1874 = vpow2.f32 %v1271_v6  ;;  %v1248_v56 = vsub.f32 %v2681_v53, %v1230_v55 }
 0x2ec   : > { %v2744_v62 = vpop.eup %1870  ;;  %v1277_v39 = vmul.f32 1.442695, %v1248_v56 }
 0x2ed   : > { %1299 = vadd.xlane.f32.xlu1 %v2744_v62  ;;  %v1228_v57 = vpop.xlane.xlu1 %1227 }
 0x2ee   : > { %1876 = vpow2.f32 %v1277_v39  ;;  %v1247_v63 = vsub.f32 %v2691_v10, %v1228_v57 }
 0x2f0   : > { %v2748_v3 = vpop.eup %1872  ;;  %v1275_v12 = vmul.f32 1.442695, %v1247_v63 }
 0x2f1   : > { %1305 = vadd.xlane.f32.xlu0 %v2748_v3 }
 0x2f2   : > { %1878 = vpow2.f32 %v1275_v12  ;;  %v1232_v22 = vpop.xlane.xlu1 %1231 }
 0x2f3   : > { %v1249_v23 = vsub.f32 %v2696_v2, %v1232_v22 }
 0x2f4   : > { %v2752_v24 = vpop.eup %1874 }
 0x2f5   : > { %v1279_v53 = vmul.f32 1.442695, %v1249_v23  ;;  %1303 = vadd.xlane.f32.xlu1 %v2752_v24 }
 0x2f6   : > { %v1234_v25 = vpop.xlane.xlu1 %1233 }
 0x2f7   : > { %1880 = vpow2.f32 %v1279_v53  ;;  %v1250_v18 = vsub.f32 %v2701_v21, %v1234_v25 }
 0x2f8   : > { %v2756_v10 = vpop.eup %1876 }
 0x2f9   : > { %v1281_v19 = vmul.f32 1.442695, %v1250_v18  ;;  %1309 = vadd.xlane.f32.xlu0 %v2756_v10 }
 0x2fb   : > { %1882 = vpow2.f32 %v1281_v19 }
 0x2fc   : > { %v2759_v20 = vpop.eup %1878 }
 0x2fd   : > { %1307 = vadd.xlane.f32.xlu1 %v2759_v20 }
 0x301   : > { %v2762_v2 = vpop.eup %1880 }
 0x302   : > { %1311 = vadd.xlane.f32.xlu1 %v2762_v2 }
 0x305   : > { %v2765_v11 = vpop.eup %1882 }
 0x306   : > { %1313 = vadd.xlane.f32.xlu0 %v2765_v11 }
 0x356   : > { %v1286_v27 = vpop.xlane.xlu1 %1285 }
 0x357   : > { %1884 = vrcp.f32 %v1286_v27 }
 0x35a   : > { %v1284_v21 = vpop.xlane.xlu1 %1283 }
 0x35b   : > { %1886 = vrcp.f32 %v1284_v21 }
 0x35e   : > { %v1290_v28 = vpop.xlane.xlu0 %1289 }
 0x35f   : > { %1888 = vrcp.f32 %v1290_v28 }
 0x361   : > { %v1885_v29 = vpop.eup %1884 }
 0x362   : > { %v1318_v31 = vmul.f32 %v1885_v29, %v2708_v5  ;;  %v1288_v32 = vpop.xlane.xlu1 %1287 }
 0x363   : > { %1890 = vrcp.f32 %v1288_v32 }
 0x364   : > { %1348 = vst [vmem:[%s2770_s30 + $0x8] sm:$0xff] %v1318_v31 }
 0x365   : > { %v1887_v33 = vpop.eup %1886 }
 0x366   : > { %v1316_v34 = vmul.f32 %v1887_v33, %v2712_v37  ;;  %v1294_v4 = vpop.xlane.xlu0 %1293 }
 0x367   : > { %1892 = vrcp.f32 %v1294_v4 }
 0x368   : > { %1347 = vst [vmem:[%s2770_s30] sm:$0xff] %v1316_v34 }
 0x369   : > { %v1889_v59 = vpop.eup %1888 }
 0x36a   : > { %v1322_v30 = vmul.f32 %v1889_v59, %v2716_v8  ;;  %v1292_v5 = vpop.xlane.xlu1 %1291 }
 0x36b   : > { %1894 = vrcp.f32 %v1292_v5 }
 0x36c   : > { %1350 = vst [vmem:[%s2770_s30 + $0x18] sm:$0xff] %v1322_v30 }
 0x36d   : > { %v1891_v36 = vpop.eup %1890 }
 0x36e   : > { %v1320_v42 = vmul.f32 %v1891_v36, %v2720_v41  ;;  %v1298_v48 = vpop.xlane.xlu0 %1297 }
 0x36f   : > { %1896 = vrcp.f32 %v1298_v48 }
 0x370   : > { %1349 = vst [vmem:[%s2770_s30 + $0x10] sm:$0xff] %v1320_v42 }
 0x371   : > { %v1893_v38 = vpop.eup %1892 }
 0x372   : > { %v1326_v37 = vmul.f32 %v1893_v38, %v2724_v45  ;;  %v1296_v1 = vpop.xlane.xlu1 %1295 }
 0x373   : > { %1898 = vrcp.f32 %v1296_v1 }
 0x374   : > { %1352 = vst [vmem:[%s2770_s30 + $0x28] sm:$0xff] %v1326_v37 }
 0x375   : > { %v1895_v13 = vpop.eup %1894 }
 0x376   : > { %v1324_v8 = vmul.f32 %v1895_v13, %v2728_v49  ;;  %v1302_v58 = vpop.xlane.xlu0 %1301 }
 0x377   : > { %1900 = vrcp.f32 %v1302_v58 }
 0x378   : > { %1351 = vst [vmem:[%s2770_s30 + $0x20] sm:$0xff] %v1324_v8 }
 0x379   : > { %v1897_v15 = vpop.eup %1896 }
 0x37a   : > { %v1330_v40 = vmul.f32 %v1897_v15, %v2732_v61  ;;  %v1300_v41 = vpop.xlane.xlu1 %1299 }
 0x37b   : > { %1902 = vrcp.f32 %v1300_v41 }
 0x37c   : > { %1354 = vst [vmem:[%s2770_s30 + $0x38] sm:$0xff] %v1330_v40 }
 0x37d   : > { %v1899_v35 = vpop.eup %1898 }
 0x37e   : > { %v1328_v43 = vmul.f32 %v1899_v35, %v2736_v16  ;;  %v1306_v44 = vpop.xlane.xlu0 %1305 }
 0x37f   : > { %1904 = vrcp.f32 %v1306_v44 }
 0x380   : > { %1353 = vst [vmem:[%s2770_s30 + $0x30] sm:$0xff] %v1328_v43 }
 0x381   : > { %v1901_v45 = vpop.eup %1900 }
 0x382   : > { %v1334_v60 = vmul.f32 %v1901_v45, %v2740_v54  ;;  %v1304_v46 = vpop.xlane.xlu1 %1303 }
 0x383   : > { %1906 = vrcp.f32 %v1304_v46 }
 0x384   : > { %1356 = vst [vmem:[%s2770_s30 + $0x48] sm:$0xff] %v1334_v60 }
 0x385   : > { %v1903_v47 = vpop.eup %1902 }
 0x386   : > { %v1332_v49 = vmul.f32 %v1903_v47, %v2744_v62  ;;  %v1310_v51 = vpop.xlane.xlu0 %1309 }
 0x387   : > { %1908 = vrcp.f32 %v1310_v51 }
 0x388   : > { %1355 = vst [vmem:[%s2770_s30 + $0x40] sm:$0xff] %v1332_v49 }
 0x389   : > { %v1905_v50 = vpop.eup %1904 }
 0x38a   : > { %v1338_v7 = vmul.f32 %v1905_v50, %v2748_v3  ;;  %v1308_v61 = vpop.xlane.xlu1 %1307 }
 0x38b   : > { %1910 = vrcp.f32 %v1308_v61 }
 0x38c   : > { %1358 = vst [vmem:[%s2770_s30 + $0x58] sm:$0xff] %v1338_v7 }
 0x38d   : > { %v1907_v0 = vpop.eup %1906 }
 0x38e   : > { %v1336_v9 = vmul.f32 %v1907_v0, %v2752_v24 }
 0x38f   : > { %v1312_v52 = vpop.xlane.xlu1 %1311 }
 0x390   : > { %1357 = vst [vmem:[%s2770_s30 + $0x50] sm:$0xff] %v1336_v9  ;;  %1912 = vrcp.f32 %v1312_v52 }
 0x391   : > { %v1909_v16 = vpop.eup %1908 }
 0x392   : > { %v1342_v26 = vmul.f32 %v1909_v16, %v2756_v10 }
 0x393   : > { %v1314_v14 = vpop.xlane.xlu0 %1313 }
 0x394   : > { %1360 = vst [vmem:[%s2770_s30 + $0x68] sm:$0xff] %v1342_v26  ;;  %1914 = vrcp.f32 %v1314_v14 }
 0x395   : > { %v1911_v17 = vpop.eup %1910 }
 0x396   : > { %v1340_v54 = vmul.f32 %v1911_v17, %v2759_v20 }
 0x398   : > { %1359 = vst [vmem:[%s2770_s30 + $0x60] sm:$0xff] %v1340_v54 }
 0x39a   : > { %v1913_v6 = vpop.eup %1912 }
 0x39b   : > { %v1344_v55 = vmul.f32 %v1913_v6, %v2762_v2 }
 0x39d   : > { %1361 = vst [vmem:[%s2770_s30 + $0x70] sm:$0xff] %v1344_v55 }
 0x39e   : > { %v1915_v56 = vpop.eup %1914 }
 0x39f   : > { %v1346_v62 = vmul.f32 %v1915_v56, %v2765_v11 }
 0x3a1   : > { %1362 = vst [vmem:[%s2770_s30 + $0x78] sm:$0xff] %v1346_v62 }
 0x3a2   : > { %2019 = shalt.err (!%p2016_p4)
}
 0x3a3   : > { %s2020_s20 = scalar_lea.hbm %s2807_s11, 2048  ;;  %s2024_s7 = scalar_lea.hbm %s2877_s3, 16384 }
 0x3a4   : > { %p2021_p10 = scmp.ne.s32.totalorder %s2807_s11, %s2020_s20  ;;  %p2025_p12 = scmp.lt.u32.totalorder %s2807_s11, %s2877_s3 }
 0x3a5   : > { %p2026_p11 = scmp.lt.u32.totalorder %s2024_s7, %s2020_s20  ;;  %p2028_p3 = scmp.lt.u32.totalorder %s2020_s20, %s2807_s11 }
 0x3a6   : > { %p2022_p8 = pnand %p2021_p10, %p2923_p5 }
 0x3a7   : > { %p2027_p13 = por %p2026_p11, %p2025_p12 }
 0x3a8   : > { %p2023_p7 = pneg %p2022_p8 }
 0x3a9   : > { %p2029_p6 = por %p2028_p3, %p2027_p13 }
 0x3ab   : > { %p2030_p0 = pnand %p2029_p6, %p2023_p7 }
 0x3ad   : > { %2033 = shalt.err (!%p2030_p0)
}
 0x3ae   : > { %s2144_s1 = smov 128   ;;  %s2145_s12 = smov 8  }
 0x3af   : > { %1741 = dma.vmem_to_hbm [thread:$0]  (%p2923_p5), %s2809_s24, 2048, %s2807_s11, %s1364_s18, %s2144_s1, %s2144_s1, %s2145_s12  }
 0x3b0 PF: > { %s2924_s28 = sld [smem:[#allocation13_spill]]  ;;  %s2925_s5 = sld [smem:[#allocation17_spill]] }
 0x3b1   : > { %p1758_p2 = scmp.ge.s32.totalorder %s2136_s22, 2 }
 0x3b6   : > { %s1396_s25 = sand.u32 1, %s2924_s28   ;;  %p2926_p9 = scmp.ne.s32.totalorder %s2925_s5, 0 }
 0x3b7   : > { %s1397_s9 = scalar_lea.sflag [#allocation4], %s1396_s25 }
 0x3b8   : > { %p1754_p1 = pnand %p1758_p2, %p2926_p9 }
 0x3ba   : > { %2091 = dma.done.wait (!%p1754_p1), %s1397_s9, 2048  }
 0x3bb   : > { %2093 = vsyncadd (!%p1754_p1), %s1397_s9, 4294965248  ;;  %s22_s22 = sadd.s32 1, %s2136_s22   ;;  %s2927_s4 = sld [smem:[#allocation18_spill]] }
 0x3bc   : > { %p19_p4 = scmp.ge.s32.totalorder %s22_s22, 10   ;;  %s2928_s18 = sld [smem:[#allocation14_spill]] }
 0x3bd   : > { %s2929_s20 = sld [smem:[#allocation15_spill]]  ;;  %s2930_s29 = sld [smem:[#allocation16_spill]] }
 0x3be   : > { %s2931_s12 = smov %s2100_s13  ;;  %s2932_s13 = smov %s2104_s14 }
 0x3bf   : > { %s2933_s14 = smov %s2389_s27  ;;  %s2934_s15 = smov %s2112_s16 }
 0x3c0   : > { %s2935_s16 = smov %s2116_s17  ;;  %s2937_s19 = smov %s2132_s21 }
 0x3c1   : > { %s2936_s17 = smov %s2927_s4  ;;  %21 = sbr.rel (!%p19_p4) target bundleno = 13 (0xd), region = 105 }
 0x3c3   : > { %s2938_s21 = smov %s2930_s29 }
 0x3c8   :  { %1402 = vsyncpa [#allocation3], 1 }
 0x3c9   :  { %1404 = vsyncpa [#allocation3 + $0x1], 1 }
 0x3ca   :  { %1405 = vsyncpa [#allocation6], 1 }
 0x3cb   :  { %1407 = vsyncpa [#allocation6 + $0x1], 1 }
 0x3cc   :  { %1408 = vsyncpa [#allocation4], 1 }
 0x3cd   :  { %1410 = vsyncpa [#allocation4 + $0x1], 1 }

</bundles_post_ra>
